<compile_context>
chip_gen: v7x
topology: tpu7x:2x2x1
jax: 0.10.0
libtpu: 0.0.40
codegen_flags: <defaults>
</compile_context>

<pallas_src>
import functools
import math

import jax
import jax.numpy as jnp
from jax.experimental import pallas as pl
from jax.experimental.pallas import tpu as pltpu


def _round_up(v, m):
    return ((v + m - 1) // m) * m


def _pick_tile(dim_pad, unit, cap):
    """Largest multiple of `unit` that divides `dim_pad` and is <= cap.

    `dim_pad` is already a multiple of `unit`, so this never adds padding
    beyond the hardware (8,128) units.
    """
    if dim_pad <= cap:
        return dim_pad
    t = (cap // unit) * unit
    while t > unit:
        if dim_pad % t == 0:
            return t
        t -= unit
    return unit


def _dot_bias_kernel(x_ref, w_ref, b_ref, o_ref):
    """Single-pass tile: o = x @ w_masked + bias (no scratch, no K loop)."""
    o_ref[...] = (
        jnp.dot(x_ref[...], w_ref[...], preferred_element_type=jnp.float32)
        + b_ref[...]
    ).astype(o_ref.dtype)


def _dot_bias_acc_kernel(x_ref, w_ref, b_ref, o_ref, acc_ref):
    """Multi-step K reduction: acc over k, bias+store only on the last step."""
    k = pl.program_id(2)
    partial = jnp.dot(x_ref[...], w_ref[...], preferred_element_type=jnp.float32)

    @pl.when(k == 0)
    def _first():
        acc_ref[...] = partial          # no zero-fill pass

    @pl.when(k != 0)
    def _accumulate():
        acc_ref[...] += partial

    @pl.when(k == pl.num_programs(2) - 1)
    def _finalize():
        o_ref[...] = (acc_ref[...] + b_ref[...]).astype(o_ref.dtype)


def filter_linear(x, weight, filter_square_matrix, bias=None, *,
                  tm_max=512, tn_max=512, tk_max=1024,
                  single_block_limit_bytes=2 * 1024 * 1024):
    """y = x @ (filter * weight).T + bias.

    x: (B, in), weight/filter: (out, in), bias: (out,) or None -> (B, out).
    """
    B, K = x.shape
    N, K2 = weight.shape
    assert K == K2, "weight / x in_features mismatch"
    assert filter_square_matrix.shape == (N, K), "filter shape mismatch"

    dtype = x.dtype
    if bias is None:
        bias = jnp.zeros((N,), dtype)

    # Hardware-unit padding only (sublane 8 / lane 128). Zero padding is exact:
    # padded K rows contribute 0, padded N columns are sliced off below.
    B_pad = _round_up(B, 8)
    K_pad = _round_up(K, 128)
    N_pad = _round_up(N, 128)

    # Fold the non-trainable 0/1 filter into the weight once, in the wrapper,
    # and lay it out (in_features, out_features) so the kernel is a plain
    # lane-dense (tm,tk)@(tk,tn) MXU matmul with a lane-dense output.
    # One fused expression so XLA fuses mask*weight with transpose/pad.
    masked_w_t = (filter_square_matrix.astype(dtype) * weight.astype(dtype)).T
    if (K_pad, N_pad) != (K, N):
        wt = jnp.zeros((K_pad, N_pad), dtype).at[:K, :N].set(masked_w_t)
    else:
        wt = masked_w_t

    if (B_pad, K_pad) != (B, K):
        xp = jnp.zeros((B_pad, K_pad), dtype).at[:B, :K].set(x)
    else:
        xp = x

    bp = jnp.zeros((1, N_pad), dtype).at[0, :N].set(bias.astype(dtype))

    itemsize = jnp.dtype(dtype).itemsize
    total_bytes = (B_pad * K_pad + K_pad * N_pad + B_pad * N_pad + N_pad) * itemsize

    # ---- Tiny-shape fast path (the actual GRU-D regime) -------------------
    if total_bytes <= single_block_limit_bytes:
        out = pl.pallas_call(
            _dot_bias_kernel,
            out_shape=jax.ShapeDtypeStruct((B_pad, N_pad), dtype),
        )(xp, wt, bp)
        return out[:B, :N]

    # ---- Tiled, pipelined path --------------------------------------------
    tm = _pick_tile(B_pad, 8, tm_max)
    tn = _pick_tile(N_pad, 128, tn_max)
    tk = _pick_tile(K_pad, 128, tk_max)

    gi = B_pad // tm
    gj = N_pad // tn
    gk = K_pad // tk

    # v7x megacore: make sure at least one "parallel" grid axis has extent >= 2
    # so both TensorCores get work.
    if gi == 1 and gj == 1:
        if N_pad % 256 == 0:
            tn = N_pad // 2
            gj = 2
        elif B_pad % 16 == 0:
            tm = B_pad // 2
            gi = 2

    if gk == 1:
        # No K reduction -> no accumulator scratch, single write per tile.
        out = pl.pallas_call(
            _dot_bias_kernel,
            out_shape=jax.ShapeDtypeStruct((B_pad, N_pad), dtype),
            grid_spec=pltpu.PrefetchScalarGridSpec(
                num_scalar_prefetch=0,
                grid=(gi, gj),
                in_specs=[
                    pl.BlockSpec((tm, K_pad), lambda i, j: (i, 0)),   # x
                    pl.BlockSpec((K_pad, tn), lambda i, j: (0, j)),   # masked W.T
                    pl.BlockSpec((1, tn), lambda i, j: (0, j)),       # bias row
                ],
                out_specs=pl.BlockSpec((tm, tn), lambda i, j: (i, j)),
            ),
            compiler_params=pltpu.CompilerParams(
                dimension_semantics=("parallel", "parallel")),
        )(xp, wt, bp)
    else:
        out = pl.pallas_call(
            _dot_bias_acc_kernel,
            out_shape=jax.ShapeDtypeStruct((B_pad, N_pad), dtype),
            grid_spec=pltpu.PrefetchScalarGridSpec(
                num_scalar_prefetch=0,
                grid=(gi, gj, gk),
                in_specs=[
                    pl.BlockSpec((tm, tk), lambda i, j, k: (i, k)),   # x
                    pl.BlockSpec((tk, tn), lambda i, j, k: (k, j)),   # masked W.T
                    pl.BlockSpec((1, tn), lambda i, j, k: (0, j)),    # bias row
                ],
                out_specs=pl.BlockSpec((tm, tn), lambda i, j, k: (i, j)),
                scratch_shapes=[pltpu.VMEM((tm, tn), jnp.float32)],
            ),
            compiler_params=pltpu.CompilerParams(
                dimension_semantics=("parallel", "parallel", "arbitrary")),
        )(xp, wt, bp)

    return out[:B, :N]


if __name__ == "__main__":
    key = jax.random.PRNGKey(0)
    kx, kw, kb, k2x, k2w, k2b, k2f = jax.random.split(key, 7)

    # ---- Test 1: GRU-D usage — square, identity filter, tiny shapes --------
    B, in_features, out_features = 8, 32, 32
    stdv = 1.0 / math.sqrt(in_features)
    weight = jax.random.uniform(
        kw, (out_features, in_features), jnp.float32, -stdv, stdv)
    bias = jax.random.uniform(kb, (out_features,), jnp.float32, -stdv, stdv)
    filt = jnp.eye(out_features, in_features, dtype=jnp.float32)
    x = jax.random.normal(kx, (B, in_features), jnp.float32)

    y = jax.jit(filter_linear)(x, weight, filt, bias)
    jax.block_until_ready(y)
    y_ref = x @ (filt * weight).T + bias
    assert y.shape == (B, out_features)
    assert jnp.allclose(y, y_ref, atol=1e-5, rtol=1e-5)

    # No-bias variant (module supports bias=False).
    y_nb = jax.jit(filter_linear)(x, weight, filt, None)
    jax.block_until_ready(y_nb)
    assert jnp.allclose(y_nb, x @ (filt * weight).T, atol=1e-5, rtol=1e-5)

    # ---- Test 2: general 0/1 mask, non-aligned dims (fast path) ------------
    B2, in2, out2 = 16, 256, 192
    stdv2 = 1.0 / math.sqrt(in2)
    weight2 = jax.random.uniform(k2w, (out2, in2), jnp.float32, -stdv2, stdv2)
    bias2 = jax.random.uniform(k2b, (out2,), jnp.float32, -stdv2, stdv2)
    filt2 = (jax.random.uniform(k2f, (out2, in2)) > 0.5).astype(jnp.float32)
    x2 = jax.random.normal(k2x, (B2, in2), jnp.float32)
    y2_ref = x2 @ (filt2 * weight2).T + bias2

    y2 = jax.jit(filter_linear)(x2, weight2, filt2, bias2)
    jax.block_until_ready(y2)
    assert y2.shape == (B2, out2)
    assert jnp.allclose(y2, y2_ref, atol=1e-4, rtol=1e-4)

    # ---- Test 3: force tiled gk==1 path (+ megacore N split heuristic) -----
    y3 = jax.jit(functools.partial(filter_linear, single_block_limit_bytes=0))(
        x2, weight2, filt2, bias2)
    jax.block_until_ready(y3)
    assert jnp.allclose(y3, y2_ref, atol=1e-4, rtol=1e-4)

    # ---- Test 4: force tiled multi-K accumulator path -----------------------
    y4 = jax.jit(functools.partial(
        filter_linear, single_block_limit_bytes=0,
        tm_max=8, tn_max=128, tk_max=128))(x2, weight2, filt2, bias2)
    jax.block_until_ready(y4)
    assert jnp.allclose(y4, y2_ref, atol=1e-4, rtol=1e-4)

    print("KERNEL_OK")
</pallas_src>

<mosaic_0001>
module attributes {stable_mosaic.version = 11 : i64} {
  func.func @_dot_bias_kernel(%arg0: memref<8x128xf32, #tpu.memory_space<vmem>>, %arg1: memref<128x128xf32, #tpu.memory_space<vmem>>, %arg2: memref<1x128xf32, #tpu.memory_space<vmem>>, %arg3: memref<8x128xf32, #tpu.memory_space<vmem>>) attributes {dimension_semantics = [], scalar_prefetch = 0 : i64, scratch_operands = 0 : i64, tpu.core_type = #tpu.core_type<tc>} {
    %c0 = arith.constant 0 : index
    %c0_0 = arith.constant 0 : index
    %0 = vector.load %arg0[%c0, %c0_0] : memref<8x128xf32, #tpu.memory_space<vmem>>, vector<8x128xf32>
    %c0_1 = arith.constant 0 : index
    %c0_2 = arith.constant 0 : index
    %1 = vector.load %arg1[%c0_1, %c0_2] : memref<128x128xf32, #tpu.memory_space<vmem>>, vector<128x128xf32>
    %cst = arith.constant dense<0.000000e+00> : vector<8x128xf32>
    %2 = tpu.matmul %0, %1, %cst {dimension_numbers = #tpu.dot_dimension_numbers<[1], [0], [0], [1], [0, 0, 1, 1], [], []>} : vector<8x128xf32>, vector<128x128xf32>, vector<8x128xf32> -> vector<8x128xf32>
    %c0_3 = arith.constant 0 : index
    %c0_4 = arith.constant 0 : index
    %3 = vector.load %arg2[%c0_3, %c0_4] : memref<1x128xf32, #tpu.memory_space<vmem>>, vector<1x128xf32>
    %4 = vector.broadcast %3 : vector<1x128xf32> to vector<8x128xf32>
    %5 = arith.addf %2, %4 : vector<8x128xf32>
    %c0_5 = arith.constant 0 : index
    %c0_6 = arith.constant 0 : index
    %6 = vector.load %arg3[%c0_5, %c0_6] : memref<8x128xf32, #tpu.memory_space<vmem>>, vector<8x128xf32>
    tpu.vector_store %arg3[%c0_5, %c0_6], %5 {strides = array<i32>} : memref<8x128xf32, #tpu.memory_space<vmem>>, vector<8x128xf32>,
    return
  }
}

</mosaic_0001>

<bundles_post_ra>
// kernel: filter_linear.1
= control target key start
LH: loop header
LB: loop body
LE: loop exit
PB: predicated region body
PF: predicated region fallthrough
CT: control target
= control target key end

     0   :  { %v229_v3 = vmov 0.0|0.0   ;;  %vm230_vm0 = vmmov 0   ;;  %v231_v6 = vmov 0.0   ;;  %s319_s0 = inlined_call_operand.vmem [shape: f32[8,128], index: 0, kind: input, shape index: {}]   ;;  %s320_s1 = inlined_call_operand.vmem [shape: f32[128,128], index: 1, kind: input, shape index: {}]   ;;  %s321_s2 = inlined_call_operand.vmem [shape: f32[1,128], index: 2, kind: input, shape index: {}]   ;;  %s322_s3 = inlined_call_operand.hbm [shape: f32[8,128], index: 3, kind: output, shape index: {}]  }
   0x1   :  { %v16_v0 = vld [vmem:[%s320_s1] sm:$0xff]  ;;  %v17_v1 = vld [vmem:[%s320_s1 + $0x8] sm:$0xff]  ;;  %v18_v2 = vld [vmem:[%s320_s1 + $0x10] sm:$0xff]  ;;  %177 = vmatprep.subr.bf16.mxu0 %v229_v3  ;;  %174 = vmatprep.mubr.msk.f32.mxu0 %vm230_vm0, %v231_v6 }
   0x2   :  { %v178_v4 = vpack.c.bf16 %v17_v1, %v16_v0  ;;  %v19_v5 = vld [vmem:[%s320_s1 + $0x18] sm:$0xff]  ;;  %v20_v8 = vld [vmem:[%s320_s1 + $0x20] sm:$0xff]  ;;  %v21_v9 = vld [vmem:[%s320_s1 + $0x28] sm:$0xff] }
   0x3   :  { %v181_v7 = vpack.c.bf16 %v19_v5, %v18_v2 }
   0x4   :  { %179 = vmatpush3.bf16.msra.mxu0 %v178_v4 }
   0x5   :  { %180 = vmatprep.subr.bf16.mxu0 %v229_v3 }
   0x6   :  { %8 = vsyncpa [#allocation3], 0  ;;  %v184_v10 = vpack.c.bf16 %v21_v9, %v20_v8  ;;  %v22_v11 = vld [vmem:[%s320_s1 + $0x30] sm:$0xff]  ;;  %v23_v12 = vld [vmem:[%s320_s1 + $0x38] sm:$0xff]  ;;  %s232_s21 = smov [#allocation2]  }
   0x7   :  { %v187_v13 = vpack.c.bf16 %v23_v12, %v22_v11  ;;  %v24_v14 = vld [vmem:[%s320_s1 + $0x40] sm:$0xff]  ;;  %v25_v15 = vld [vmem:[%s320_s1 + $0x48] sm:$0xff]  ;;  %v26_v17 = vld [vmem:[%s320_s1 + $0x50] sm:$0xff]  ;;  %s116_s22 = sshll.u32 %s232_s21, 4  ;;  %s117_s22 = int_to_ptr.vmem [resolvable:$true] %s116_s22 }
   0x8   :  { %182 = vmatpush3.bf16.msra.mxu0 %v181_v7  ;;  %v190_v16 = vpack.c.bf16 %v25_v15, %v24_v14  ;;  %v27_v18 = vld [vmem:[%s320_s1 + $0x58] sm:$0xff]  ;;  %v28_v20 = vld [vmem:[%s320_s1 + $0x60] sm:$0xff]  ;;  %v29_v21 = vld [vmem:[%s320_s1 + $0x68] sm:$0xff]  ;;  %p210_p1 = scmp.lt.s32.totalorder %s117_s22, %s117_s22 }
   0x9   :  { %183 = vmatprep.subr.bf16.mxu0 %v229_v3  ;;  %v193_v19 = vpack.c.bf16 %v27_v18, %v26_v17  ;;  %v196_v22 = vpack.c.bf16 %v29_v21, %v28_v20  ;;  %v30_v23 = vld [vmem:[%s320_s1 + $0x70] sm:$0xff]  ;;  %v31_v24 = vld [vmem:[%s320_s1 + $0x78] sm:$0xff]  ;;  %v15_v26 = vld [vmem:[%s319_s0] sm:$0xff]  ;;  %s205_s1 = scalar_lea.vmem %s117_s22, 128 }
   0xa   :  { %v199_v25 = vpack.c.bf16 %v31_v24, %v30_v23  ;;  %v124_v27 = vld [vmem:[%s321_s2] ss:$0 sm:$0xff]  ;;  %p206_p0 = scmp.ne.s32.totalorder %s117_s22, %s205_s1  ;;  %p211_p2 = scmp.lt.s32.totalorder %s205_s1, %s205_s1 }
   0xc   :  { %185 = vmatpush3.bf16.msra.mxu0 %v184_v10  ;;  %p212_p3 = por %p211_p2, %p210_p1 }
   0xd   :  { %186 = vmatprep.subr.bf16.mxu0 %v229_v3 }
   0xe   :  { %p213_p4 = pnand %p212_p3, %p206_p0 }
  0x10   :  { %188 = vmatpush3.bf16.msra.mxu0 %v187_v13 }
  0x11   :  { %189 = vmatprep.subr.bf16.mxu0 %v229_v3 }
  0x14   :  { %191 = vmatpush3.bf16.msra.mxu0 %v190_v16 }
  0x15   :  { %192 = vmatprep.subr.bf16.mxu0 %v229_v3 }
  0x18   :  { %194 = vmatpush3.bf16.msra.mxu0 %v193_v19 }
  0x19   :  { %195 = vmatprep.subr.bf16.mxu0 %v229_v3 }
  0x1c   :  { %197 = vmatpush3.bf16.msra.mxu0 %v196_v22 }
  0x1d   :  { %198 = vmatprep.subr.bf16.mxu0 %v229_v3 }
  0x20   :  { %200 = vmatpush3.bf16.msra.mxu0 %v199_v25 }
  0x23   :  { %175 = vmatmul.mubr.f32.vlgmr.msra.gmra.mrb[0].mxu0 %v15_v26 }
  0xf6   :  { %v105_v28 = vpop.f32.mrb[0].mxu0 }
  0xf7   :  { %v106_v29 = vadd.f32 %v124_v27, %v105_v28  ;;  %v176_v30 = vpop.f32.mrb[1].mxu0 }
  0xf9   :  { %109 = vst [vmem:[#allocation2] sm:$0xff] %v106_v29 }
  0xfa   :  { %216 = shalt.err (!%p213_p4)
}
  0xfb   :  { %s217_s24 = scalar_lea.hbm %s322_s3, 128 }
  0xfc   :  { %p218_p5 = scmp.ne.s32.totalorder %s322_s3, %s217_s24  ;;  %p221_p6 = scmp.lt.u32.totalorder %s217_s24, %s322_s3 }
  0xfe   :  { %p223_p7 = pnand %p221_p6, %p218_p5 }
 0x100   :  { %226 = shalt.err (!%p223_p7)
}
 0x101   :  { %119 = dma.vmem_to_hbm [thread:$0]  %s117_s22, 128, %s322_s3, [#allocation3]  }
 0x102   :  { %227 = dma.done.wait [#allocation3], 128  }
 0x103   :  { %228 = vsyncadd [#allocation3], 4294967168 }
 0x104   :  { %123 = vsyncpa [#allocation3], 1 }

</bundles_post_ra>
